<compile_context>
chip_gen: v5e
topology: v5e:2x2
jax: 0.10.0
libtpu: 0.0.40
codegen_flags: <defaults>
</compile_context>

<pallas_src>
import jax
import jax.numpy as jnp
import numpy as np
from jax.experimental import pallas as pl
from jax.experimental.pallas import tpu as pltpu

_CP = 128                       # lane-padded channel width (MXU / lane width)
_EPS = 0.8                      # BatchNorm2d(c, 0.8) from the PyTorch model
_VMEM_LIMIT = 32 * 1024 * 1024  # explicit scoped-VMEM budget (ok v5e..v7x)


def _round_up(x, m):
    return (x + m - 1) // m * m


# -----------------------------------------------------------------------------
# Pallas kernels
# -----------------------------------------------------------------------------
def _conv_block_kernel(p_ref, w_ref, b_ref, s_ref, t_ref, o_ref):
    # (TM, K) bf16 @ (K, 128) bf16 -> f32 on the MXU
    acc = jnp.dot(p_ref[...], w_ref[...], preferred_element_type=jnp.float32)
    acc = acc + b_ref[...]                          # conv bias
    acc = jnp.where(acc >= 0.0, acc, 0.2 * acc)     # LeakyReLU(0.2)
    # Dropout2d(0.25): identity in eval mode.
    acc = acc * s_ref[...] + t_ref[...]             # folded eval-mode BN
    o_ref[...] = acc.astype(o_ref.dtype)            # bf16 writeback


def _conv_block_head_kernel(p_ref, w_ref, b_ref, s_ref, t_ref,
                            hw_ref, hb_ref, o_ref):
    acc = jnp.dot(p_ref[...], w_ref[...], preferred_element_type=jnp.float32)
    acc = acc + b_ref[...]
    acc = jnp.where(acc >= 0.0, acc, 0.2 * acc)
    acc = acc * s_ref[...] + t_ref[...]
    # Fused Linear(128 -> 1) + Sigmoid: row-reduce against the head weight row.
    z = jnp.sum(acc * hw_ref[...], axis=-1, keepdims=True) + hb_ref[...]
    o_ref[...] = pl.reciprocal(1.0 + jnp.exp(-z))


def _adv_kernel(x_ref, w_ref, b_ref, o_ref):
    z = jnp.dot(x_ref[...], w_ref[...], preferred_element_type=jnp.float32)
    z = z + b_ref[...]
    o_ref[...] = pl.reciprocal(1.0 + jnp.exp(-z))


# -----------------------------------------------------------------------------
# Wrappers
# -----------------------------------------------------------------------------
def _im2col(x_nhwc, k=3, stride=2, pad=1):
    N, H, W, C = x_nhwc.shape
    xp = jnp.pad(x_nhwc, ((0, 0), (pad, pad), (pad, pad), (0, 0)))
    Ho = (H + 2 * pad - k) // stride + 1
    Wo = (W + 2 * pad - k) // stride + 1
    cols = []
    for di in range(k):
        for dj in range(k):
            cols.append(xp[:, di:di + stride * Ho:stride,
                           dj:dj + stride * Wo:stride, :])
    # flat patch ordering is ((di*3 + dj) * Cin + ci), matching w_pad rows
    patches = jnp.concatenate(cols, axis=-1)          # (N, Ho, Wo, 9*C)
    return patches, Ho, Wo


_CPARAMS = pltpu.CompilerParams(dimension_semantics=("parallel",),
                                vmem_limit_bytes=_VMEM_LIMIT)


def _conv_block_call(x_nhwc, blk, head=None):
    patches, Ho, Wo = _im2col(x_nhwc)
    N = x_nhwc.shape[0]
    M = N * Ho * Wo
    K = patches.shape[-1]
    p2 = patches.reshape(M, K)

    # Row tiling: <=512 rows/step, multiple of 16 (bf16 sublane packing).
    TM = 512 if M >= 512 else _round_up(M, 16)
    M_pad = _round_up(M, TM)
    if M_pad != M:
        p2 = jnp.pad(p2, ((0, M_pad - M), (0, 0)))
    grid = (M_pad // TM,)

    def full(shape):
        return pl.BlockSpec(shape, lambda i: (0, 0))

    def rows(last):
        return pl.BlockSpec((TM, last), lambda i: (i, 0))

    if head is None:
        out = pl.pallas_call(
            _conv_block_kernel,
            out_shape=jax.ShapeDtypeStruct((M_pad, _CP), jnp.bfloat16),
            grid=grid,
            in_specs=[rows(K), full((K, _CP)), full((1, _CP)),
                      full((1, _CP)), full((1, _CP))],
            out_specs=rows(_CP),
            compiler_params=_CPARAMS,
        )(p2, blk["w_pad"], blk["b_pad"], blk["s_pad"], blk["t_pad"])
        # strip row padding + lane padding before the next layer
        return out[:M, :blk["cout"]].reshape(N, Ho, Wo, blk["cout"])

    hw_row, hb = head
    out = pl.pallas_call(
        _conv_block_head_kernel,
        out_shape=jax.ShapeDtypeStruct((M_pad, 1), jnp.float32),
        grid=grid,
        in_specs=[rows(K), full((K, _CP)), full((1, _CP)),
                  full((1, _CP)), full((1, _CP)),
                  full((1, _CP)), full((1, 1))],
        out_specs=rows(1),
        compiler_params=_CPARAMS,
    )(p2, blk["w_pad"], blk["b_pad"], blk["s_pad"], blk["t_pad"], hw_row, hb)
    return out[:M]                                    # (N, 1) since Ho=Wo=1


def _adv_call(x_nhwc, w_col, b2d):
    # General head (ds != 1): NHWC flatten + permuted head weight (no transpose)
    N = x_nhwc.shape[0]
    flat = x_nhwc.reshape(N, -1).astype(jnp.bfloat16)
    Fin = flat.shape[1]
    TN = 512 if N >= 512 else _round_up(N, 16)
    N_pad = _round_up(N, TN)
    if N_pad != N:
        flat = jnp.pad(flat, ((0, N_pad - N), (0, 0)))
    out = pl.pallas_call(
        _adv_kernel,
        out_shape=jax.ShapeDtypeStruct((N_pad, 1), jnp.float32),
        grid=(N_pad // TN,),
        in_specs=[pl.BlockSpec((TN, Fin), lambda i: (i, 0)),
                  pl.BlockSpec((Fin, 1), lambda i: (0, 0)),
                  pl.BlockSpec((1, 1), lambda i: (0, 0))],
        out_specs=pl.BlockSpec((TN, 1), lambda i: (i, 0)),
        compiler_params=_CPARAMS,
    )(flat, w_col.astype(jnp.bfloat16), b2d)
    return out[:N]


def discriminator_forward(img_nchw, params):
    # NCHW -> NHWC once; bf16 activations feed the MXU and halve patch DMA.
    x = jnp.transpose(img_nchw, (0, 2, 3, 1)).astype(jnp.bfloat16)
    blocks = params["blocks"]
    for blk in blocks[:-1]:
        x = _conv_block_call(x, blk)                  # already bf16
    last = blocks[-1]
    if params["ds"] == 1:
        # last block's 1x1 spatial output row == the 128-wide feature vector
        return _conv_block_call(
            x, last, head=(params["w_head_row"], params["b_head2d"]))
    x = _conv_block_call(x, last)
    return _adv_call(x, params["w_head_col"], params["b_head2d"])


# -----------------------------------------------------------------------------
# Deterministic synthetic parameters (PyTorch-shaped, then kernel-prepared)
# -----------------------------------------------------------------------------
def init_params(key, img_shape):
    C, H, W = img_shape
    cfg = [(C, 16, False), (16, 32, True), (32, 64, True), (64, 128, True)]
    blocks = []
    for cin, cout, use_bn in cfg:
        key, kw, kb, kg, kbt = jax.random.split(key, 5)
        w_t = jax.random.normal(kw, (cout, cin, 3, 3), jnp.float32) * 0.1
        b = jax.random.normal(kb, (cout,), jnp.float32) * 0.1
        gamma = 1.0 + 0.1 * jax.random.normal(kg, (cout,), jnp.float32)
        beta = 0.1 * jax.random.normal(kbt, (cout,), jnp.float32)
        mean = jnp.zeros((cout,), jnp.float32)
        var = jnp.ones((cout,), jnp.float32)
        if use_bn:                                    # fold eval-mode BN
            scale = gamma * jax.lax.rsqrt(var + _EPS)
            shift = beta - mean * scale
        else:
            scale = jnp.ones((cout,), jnp.float32)
            shift = jnp.zeros((cout,), jnp.float32)
        # (Cout, Cin, kh, kw) -> (kh, kw, Cin, Cout) -> (9*Cin, Cout)
        w_mat = jnp.transpose(w_t, (2, 3, 1, 0)).reshape(9 * cin, cout)
        pad_c = _CP - cout
        blocks.append(dict(
            cout=cout, use_bn=use_bn,
            w_torch=w_t, b=b, scale=scale, shift=shift,          # for the ref
            w_pad=jnp.pad(w_mat, ((0, 0), (0, pad_c))).astype(jnp.bfloat16),
            b_pad=jnp.pad(b, (0, pad_c)).reshape(1, _CP),
            s_pad=jnp.pad(scale, (0, pad_c)).reshape(1, _CP),
            t_pad=jnp.pad(shift, (0, pad_c)).reshape(1, _CP),
        ))
    ds = H // 2 ** 4
    fin = 128 * ds * ds
    key, kw, kb = jax.random.split(key, 3)
    w_lin = jax.random.normal(kw, (1, fin), jnp.float32) * 0.1
    b_lin = jax.random.normal(kb, (1,), jnp.float32) * 0.1
    # permute head-weight columns once: PyTorch flattens NCHW, kernels are NHWC
    w_lin_nhwc = jnp.transpose(
        w_lin.reshape(1, 128, ds, ds), (0, 2, 3, 1)).reshape(1, fin)
    return dict(blocks=blocks, ds=ds, w_lin=w_lin, b_lin=b_lin,
                w_head_row=w_lin_nhwc,               # (1, fin) fused head
                w_head_col=w_lin_nhwc.T,             # (fin, 1) general head
                b_head2d=b_lin.reshape(1, 1))


# -----------------------------------------------------------------------------
# Plain-JAX reference (lax.conv, same bf16 matmul operands / f32 accumulation)
# -----------------------------------------------------------------------------
def ref_forward(img_nchw, params):
    x = img_nchw
    for blk in params["blocks"]:
        y = jax.lax.conv_general_dilated(
            x.astype(jnp.bfloat16), blk["w_torch"].astype(jnp.bfloat16),
            window_strides=(2, 2), padding=((1, 1), (1, 1)),
            dimension_numbers=("NCHW", "OIHW", "NCHW"),
            preferred_element_type=jnp.float32)
        y = y + blk["b"].reshape(1, -1, 1, 1)
        y = jnp.where(y >= 0.0, y, 0.2 * y)
        y = y * blk["scale"].reshape(1, -1, 1, 1) \
            + blk["shift"].reshape(1, -1, 1, 1)
        x = y
    flat = x.reshape(x.shape[0], -1)                  # NCHW flatten, like torch
    z = flat @ params["w_lin"].T + params["b_lin"]
    return 1.0 / (1.0 + jnp.exp(-z))


# -----------------------------------------------------------------------------
if __name__ == "__main__":
    img_shape = (3, 16, 16)                 # (C, H, W); H divisible by 2**4
    key = jax.random.PRNGKey(0)
    key, kimg = jax.random.split(key)
    img = jax.random.normal(kimg, (2,) + img_shape, jnp.float32)

    params = init_params(key, img_shape)

    fwd = jax.jit(lambda im: discriminator_forward(im, params))
    out = jax.block_until_ready(fwd(img))

    assert out.shape == (2, 1), out.shape
    ref = jax.block_until_ready(ref_forward(img, params))
    np.testing.assert_allclose(np.asarray(out), np.asarray(ref),
                               rtol=1e-3, atol=1e-3)
    print("KERNEL_OK")
</pallas_src>

<mosaic_0001>
module attributes {stable_mosaic.version = 11 : i64} {
  func.func @_conv_block_kernel(%arg0: i32, %arg1: memref<128x27xbf16, #tpu.memory_space<vmem>>, %arg2: memref<27x128xbf16, #tpu.memory_space<vmem>>, %arg3: memref<1x128xf32, #tpu.memory_space<vmem>>, %arg4: memref<1x128xf32, #tpu.memory_space<vmem>>, %arg5: memref<1x128xf32, #tpu.memory_space<vmem>>, %arg6: memref<128x128xbf16, #tpu.memory_space<vmem>>) attributes {dimension_semantics = [#tpu.dimension_semantics<parallel>], iteration_bounds = array<i64: 1>, scalar_prefetch = 0 : i64, scratch_operands = 0 : i64, tpu.core_type = #tpu.core_type<tc>, window_params = [{transform_indices = @transform_0, window_bounds = array<i64: 128, 27>}, {pipeline_mode = #tpu.pipeline_mode<synchronous>, transform_indices = @transform_1, window_bounds = array<i64: 27, 128>}, {pipeline_mode = #tpu.pipeline_mode<synchronous>, transform_indices = @transform_2, window_bounds = array<i64: 1, 128>}, {pipeline_mode = #tpu.pipeline_mode<synchronous>, transform_indices = @transform_3, window_bounds = array<i64: 1, 128>}, {pipeline_mode = #tpu.pipeline_mode<synchronous>, transform_indices = @transform_4, window_bounds = array<i64: 1, 128>}, {transform_indices = @transform_5, window_bounds = array<i64: 128, 128>}]} {
    %c0 = arith.constant 0 : index
    %c0_0 = arith.constant 0 : index
    %0 = vector.load %arg1[%c0, %c0_0] : memref<128x27xbf16, #tpu.memory_space<vmem>>, vector<128x27xbf16>
    %c0_1 = arith.constant 0 : index
    %c0_2 = arith.constant 0 : index
    %1 = vector.load %arg2[%c0_1, %c0_2] : memref<27x128xbf16, #tpu.memory_space<vmem>>, vector<27x128xbf16>
    %cst = arith.constant dense<0.000000e+00> : vector<128x128xf32>
    %2 = tpu.matmul %0, %1, %cst {dimension_numbers = #tpu.dot_dimension_numbers<[1], [0], [0], [1], [0, 0, 1, 1], [], []>} : vector<128x27xbf16>, vector<27x128xbf16>, vector<128x128xf32> -> vector<128x128xf32>
    %c0_3 = arith.constant 0 : index
    %c0_4 = arith.constant 0 : index
    %3 = vector.load %arg3[%c0_3, %c0_4] : memref<1x128xf32, #tpu.memory_space<vmem>>, vector<1x128xf32>
    %4 = vector.broadcast %3 : vector<1x128xf32> to vector<128x128xf32>
    %5 = arith.addf %2, %4 : vector<128x128xf32>
    %cst_5 = arith.constant 0.000000e+00 : f32
    %6 = vector.broadcast %cst_5 : f32 to vector<128x128xf32>
    %7 = arith.cmpf oge, %5, %6 : vector<128x128xf32>
    %cst_6 = arith.constant 2.000000e-01 : f32
    %8 = vector.broadcast %cst_6 : f32 to vector<128x128xf32>
    %9 = arith.mulf %8, %5 : vector<128x128xf32>
    %10 = arith.select %7, %5, %9 : vector<128x128xi1>, vector<128x128xf32>
    %c0_7 = arith.constant 0 : index
    %c0_8 = arith.constant 0 : index
    %11 = vector.load %arg4[%c0_7, %c0_8] : memref<1x128xf32, #tpu.memory_space<vmem>>, vector<1x128xf32>
    %12 = vector.broadcast %11 : vector<1x128xf32> to vector<128x128xf32>
    %13 = arith.mulf %10, %12 : vector<128x128xf32>
    %c0_9 = arith.constant 0 : index
    %c0_10 = arith.constant 0 : index
    %14 = vector.load %arg5[%c0_9, %c0_10] : memref<1x128xf32, #tpu.memory_space<vmem>>, vector<1x128xf32>
    %15 = vector.broadcast %14 : vector<1x128xf32> to vector<128x128xf32>
    %16 = arith.addf %13, %15 : vector<128x128xf32>
    %17 = arith.truncf %16 : vector<128x128xf32> to vector<128x128xbf16>
    %c0_11 = arith.constant 0 : index
    %c0_12 = arith.constant 0 : index
    %18 = vector.load %arg6[%c0_11, %c0_12] : memref<128x128xbf16, #tpu.memory_space<vmem>>, vector<128x128xbf16>
    tpu.vector_store %arg6[%c0_11, %c0_12], %17 {strides = array<i32>} : memref<128x128xbf16, #tpu.memory_space<vmem>>, vector<128x128xbf16>,
    return
  }
  func.func @transform_0(%arg0: i32) -> (i32, i32) {
    %c0_i32 = arith.constant 0 : i32
    %c0_i32_0 = arith.constant 0 : i32
    return %arg0, %c0_i32 : i32, i32
  }
  func.func @transform_1(%arg0: i32) -> (i32, i32) {
    %c0_i32 = arith.constant 0 : i32
    %c0_i32_0 = arith.constant 0 : i32
    %c0_i32_1 = arith.constant 0 : i32
    return %c0_i32, %c0_i32_0 : i32, i32
  }
  func.func @transform_2(%arg0: i32) -> (i32, i32) {
    %c0_i32 = arith.constant 0 : i32
    %c0_i32_0 = arith.constant 0 : i32
    %c0_i32_1 = arith.constant 0 : i32
    return %c0_i32, %c0_i32_0 : i32, i32
  }
  func.func @transform_3(%arg0: i32) -> (i32, i32) {
    %c0_i32 = arith.constant 0 : i32
    %c0_i32_0 = arith.constant 0 : i32
    %c0_i32_1 = arith.constant 0 : i32
    return %c0_i32, %c0_i32_0 : i32, i32
  }
  func.func @transform_4(%arg0: i32) -> (i32, i32) {
    %c0_i32 = arith.constant 0 : i32
    %c0_i32_0 = arith.constant 0 : i32
    %c0_i32_1 = arith.constant 0 : i32
    return %c0_i32, %c0_i32_0 : i32, i32
  }
  func.func @transform_5(%arg0: i32) -> (i32, i32) {
    %c0_i32 = arith.constant 0 : i32
    %c0_i32_0 = arith.constant 0 : i32
    return %arg0, %c0_i32 : i32, i32
  }
}

module attributes {stable_mosaic.version = 11 : i64} {
  func.func @_conv_block_kernel(%arg0: i32, %arg1: memref<32x144xbf16, #tpu.memory_space<vmem>>, %arg2: memref<144x128xbf16, #tpu.memory_space<vmem>>, %arg3: memref<1x128xf32, #tpu.memory_space<vmem>>, %arg4: memref<1x128xf32, #tpu.memory_space<vmem>>, %arg5: memref<1x128xf32, #tpu.memory_space<vmem>>, %arg6: memref<32x128xbf16, #tpu.memory_space<vmem>>) attributes {dimension_semantics = [#tpu.dimension_semantics<parallel>], iteration_bounds = array<i64: 1>, scalar_prefetch = 0 : i64, scratch_operands = 0 : i64, tpu.core_type = #tpu.core_type<tc>, window_params = [{transform_indices = @transform_0, window_bounds = array<i64: 32, 144>}, {pipeline_mode = #tpu.pipeline_mode<synchronous>, transform_indices = @transform_1, window_bounds = array<i64: 144, 128>}, {pipeline_mode = #tpu.pipeline_mode<synchronous>, transform_indices = @transform_2, window_bounds = array<i64: 1, 128>}, {pipeline_mode = #tpu.pipeline_mode<synchronous>, transform_indices = @transform_3, window_bounds = array<i64: 1, 128>}, {pipeline_mode = #tpu.pipeline_mode<synchronous>, transform_indices = @transform_4, window_bounds = array<i64: 1, 128>}, {transform_indices = @transform_5, window_bounds = array<i64: 32, 128>}]} {
    %c0 = arith.constant 0 : index
    %c0_0 = arith.constant 0 : index
    %0 = vector.load %arg1[%c0, %c0_0] : memref<32x144xbf16, #tpu.memory_space<vmem>>, vector<32x144xbf16>
    %c0_1 = arith.constant 0 : index
    %c0_2 = arith.constant 0 : index
    %1 = vector.load %arg2[%c0_1, %c0_2] : memref<144x128xbf16, #tpu.memory_space<vmem>>, vector<144x128xbf16>
    %cst = arith.constant dense<0.000000e+00> : vector<32x128xf32>
    %2 = tpu.matmul %0, %1, %cst {dimension_numbers = #tpu.dot_dimension_numbers<[1], [0], [0], [1], [0, 0, 1, 1], [], []>} : vector<32x144xbf16>, vector<144x128xbf16>, vector<32x128xf32> -> vector<32x128xf32>
    %c0_3 = arith.constant 0 : index
    %c0_4 = arith.constant 0 : index
    %3 = vector.load %arg3[%c0_3, %c0_4] : memref<1x128xf32, #tpu.memory_space<vmem>>, vector<1x128xf32>
    %4 = vector.broadcast %3 : vector<1x128xf32> to vector<32x128xf32>
    %5 = arith.addf %2, %4 : vector<32x128xf32>
    %cst_5 = arith.constant 0.000000e+00 : f32
    %6 = vector.broadcast %cst_5 : f32 to vector<32x128xf32>
    %7 = arith.cmpf oge, %5, %6 : vector<32x128xf32>
    %cst_6 = arith.constant 2.000000e-01 : f32
    %8 = vector.broadcast %cst_6 : f32 to vector<32x128xf32>
    %9 = arith.mulf %8, %5 : vector<32x128xf32>
    %10 = arith.select %7, %5, %9 : vector<32x128xi1>, vector<32x128xf32>
    %c0_7 = arith.constant 0 : index
    %c0_8 = arith.constant 0 : index
    %11 = vector.load %arg4[%c0_7, %c0_8] : memref<1x128xf32, #tpu.memory_space<vmem>>, vector<1x128xf32>
    %12 = vector.broadcast %11 : vector<1x128xf32> to vector<32x128xf32>
    %13 = arith.mulf %10, %12 : vector<32x128xf32>
    %c0_9 = arith.constant 0 : index
    %c0_10 = arith.constant 0 : index
    %14 = vector.load %arg5[%c0_9, %c0_10] : memref<1x128xf32, #tpu.memory_space<vmem>>, vector<1x128xf32>
    %15 = vector.broadcast %14 : vector<1x128xf32> to vector<32x128xf32>
    %16 = arith.addf %13, %15 : vector<32x128xf32>
    %17 = arith.truncf %16 : vector<32x128xf32> to vector<32x128xbf16>
    %c0_11 = arith.constant 0 : index
    %c0_12 = arith.constant 0 : index
    %18 = vector.load %arg6[%c0_11, %c0_12] : memref<32x128xbf16, #tpu.memory_space<vmem>>, vector<32x128xbf16>
    tpu.vector_store %arg6[%c0_11, %c0_12], %17 {strides = array<i32>} : memref<32x128xbf16, #tpu.memory_space<vmem>>, vector<32x128xbf16>,
    return
  }
  func.func @transform_0(%arg0: i32) -> (i32, i32) {
    %c0_i32 = arith.constant 0 : i32
    %c0_i32_0 = arith.constant 0 : i32
    return %arg0, %c0_i32 : i32, i32
  }
  func.func @transform_1(%arg0: i32) -> (i32, i32) {
    %c0_i32 = arith.constant 0 : i32
    %c0_i32_0 = arith.constant 0 : i32
    %c0_i32_1 = arith.constant 0 : i32
    return %c0_i32, %c0_i32_0 : i32, i32
  }
  func.func @transform_2(%arg0: i32) -> (i32, i32) {
    %c0_i32 = arith.constant 0 : i32
    %c0_i32_0 = arith.constant 0 : i32
    %c0_i32_1 = arith.constant 0 : i32
    return %c0_i32, %c0_i32_0 : i32, i32
  }
  func.func @transform_3(%arg0: i32) -> (i32, i32) {
    %c0_i32 = arith.constant 0 : i32
    %c0_i32_0 = arith.constant 0 : i32
    %c0_i32_1 = arith.constant 0 : i32
    return %c0_i32, %c0_i32_0 : i32, i32
  }
  func.func @transform_4(%arg0: i32) -> (i32, i32) {
    %c0_i32 = arith.constant 0 : i32
    %c0_i32_0 = arith.constant 0 : i32
    %c0_i32_1 = arith.constant 0 : i32
    return %c0_i32, %c0_i32_0 : i32, i32
  }
  func.func @transform_5(%arg0: i32) -> (i32, i32) {
    %c0_i32 = arith.constant 0 : i32
    %c0_i32_0 = arith.constant 0 : i32
    return %arg0, %c0_i32 : i32, i32
  }
}

module attributes {stable_mosaic.version = 11 : i64} {
  func.func @_conv_block_kernel(%arg0: i32, %arg1: memref<16x288xbf16, #tpu.memory_space<vmem>>, %arg2: memref<288x128xbf16, #tpu.memory_space<vmem>>, %arg3: memref<1x128xf32, #tpu.memory_space<vmem>>, %arg4: memref<1x128xf32, #tpu.memory_space<vmem>>, %arg5: memref<1x128xf32, #tpu.memory_space<vmem>>, %arg6: memref<16x128xbf16, #tpu.memory_space<vmem>>) attributes {dimension_semantics = [#tpu.dimension_semantics<parallel>], iteration_bounds = array<i64: 1>, scalar_prefetch = 0 : i64, scratch_operands = 0 : i64, tpu.core_type = #tpu.core_type<tc>, window_params = [{transform_indices = @transform_0, window_bounds = array<i64: 16, 288>}, {pipeline_mode = #tpu.pipeline_mode<synchronous>, transform_indices = @transform_1, window_bounds = array<i64: 288, 128>}, {pipeline_mode = #tpu.pipeline_mode<synchronous>, transform_indices = @transform_2, window_bounds = array<i64: 1, 128>}, {pipeline_mode = #tpu.pipeline_mode<synchronous>, transform_indices = @transform_3, window_bounds = array<i64: 1, 128>}, {pipeline_mode = #tpu.pipeline_mode<synchronous>, transform_indices = @transform_4, window_bounds = array<i64: 1, 128>}, {transform_indices = @transform_5, window_bounds = array<i64: 16, 128>}]} {
    %c0 = arith.constant 0 : index
    %c0_0 = arith.constant 0 : index
    %0 = vector.load %arg1[%c0, %c0_0] : memref<16x288xbf16, #tpu.memory_space<vmem>>, vector<16x288xbf16>
    %c0_1 = arith.constant 0 : index
    %c0_2 = arith.constant 0 : index
    %1 = vector.load %arg2[%c0_1, %c0_2] : memref<288x128xbf16, #tpu.memory_space<vmem>>, vector<288x128xbf16>
    %cst = arith.constant dense<0.000000e+00> : vector<16x128xf32>
    %2 = tpu.matmul %0, %1, %cst {dimension_numbers = #tpu.dot_dimension_numbers<[1], [0], [0], [1], [0, 0, 1, 1], [], []>} : vector<16x288xbf16>, vector<288x128xbf16>, vector<16x128xf32> -> vector<16x128xf32>
    %c0_3 = arith.constant 0 : index
    %c0_4 = arith.constant 0 : index
    %3 = vector.load %arg3[%c0_3, %c0_4] : memref<1x128xf32, #tpu.memory_space<vmem>>, vector<1x128xf32>
    %4 = vector.broadcast %3 : vector<1x128xf32> to vector<16x128xf32>
    %5 = arith.addf %2, %4 : vector<16x128xf32>
    %cst_5 = arith.constant 0.000000e+00 : f32
    %6 = vector.broadcast %cst_5 : f32 to vector<16x128xf32>
    %7 = arith.cmpf oge, %5, %6 : vector<16x128xf32>
    %cst_6 = arith.constant 2.000000e-01 : f32
    %8 = vector.broadcast %cst_6 : f32 to vector<16x128xf32>
    %9 = arith.mulf %8, %5 : vector<16x128xf32>
    %10 = arith.select %7, %5, %9 : vector<16x128xi1>, vector<16x128xf32>
    %c0_7 = arith.constant 0 : index
    %c0_8 = arith.constant 0 : index
    %11 = vector.load %arg4[%c0_7, %c0_8] : memref<1x128xf32, #tpu.memory_space<vmem>>, vector<1x128xf32>
    %12 = vector.broadcast %11 : vector<1x128xf32> to vector<16x128xf32>
    %13 = arith.mulf %10, %12 : vector<16x128xf32>
    %c0_9 = arith.constant 0 : index
    %c0_10 = arith.constant 0 : index
    %14 = vector.load %arg5[%c0_9, %c0_10] : memref<1x128xf32, #tpu.memory_space<vmem>>, vector<1x128xf32>
    %15 = vector.broadcast %14 : vector<1x128xf32> to vector<16x128xf32>
    %16 = arith.addf %13, %15 : vector<16x128xf32>
    %17 = arith.truncf %16 : vector<16x128xf32> to vector<16x128xbf16>
    %c0_11 = arith.constant 0 : index
    %c0_12 = arith.constant 0 : index
    %18 = vector.load %arg6[%c0_11, %c0_12] : memref<16x128xbf16, #tpu.memory_space<vmem>>, vector<16x128xbf16>
    tpu.vector_store %arg6[%c0_11, %c0_12], %17 {strides = array<i32>} : memref<16x128xbf16, #tpu.memory_space<vmem>>, vector<16x128xbf16>,
    return
  }
  func.func @transform_0(%arg0: i32) -> (i32, i32) {
    %c0_i32 = arith.constant 0 : i32
    %c0_i32_0 = arith.constant 0 : i32
    return %arg0, %c0_i32 : i32, i32
  }
  func.func @transform_1(%arg0: i32) -> (i32, i32) {
    %c0_i32 = arith.constant 0 : i32
    %c0_i32_0 = arith.constant 0 : i32
    %c0_i32_1 = arith.constant 0 : i32
    return %c0_i32, %c0_i32_0 : i32, i32
  }
  func.func @transform_2(%arg0: i32) -> (i32, i32) {
    %c0_i32 = arith.constant 0 : i32
    %c0_i32_0 = arith.constant 0 : i32
    %c0_i32_1 = arith.constant 0 : i32
    return %c0_i32, %c0_i32_0 : i32, i32
  }
  func.func @transform_3(%arg0: i32) -> (i32, i32) {
    %c0_i32 = arith.constant 0 : i32
    %c0_i32_0 = arith.constant 0 : i32
    %c0_i32_1 = arith.constant 0 : i32
    return %c0_i32, %c0_i32_0 : i32, i32
  }
  func.func @transform_4(%arg0: i32) -> (i32, i32) {
    %c0_i32 = arith.constant 0 : i32
    %c0_i32_0 = arith.constant 0 : i32
    %c0_i32_1 = arith.constant 0 : i32
    return %c0_i32, %c0_i32_0 : i32, i32
  }
  func.func @transform_5(%arg0: i32) -> (i32, i32) {
    %c0_i32 = arith.constant 0 : i32
    %c0_i32_0 = arith.constant 0 : i32
    return %arg0, %c0_i32 : i32, i32
  }
}

module attributes {stable_mosaic.version = 11 : i64} {
  func.func @_conv_block_head_kernel(%arg0: i32, %arg1: memref<16x576xbf16, #tpu.memory_space<vmem>>, %arg2: memref<576x128xbf16, #tpu.memory_space<vmem>>, %arg3: memref<1x128xf32, #tpu.memory_space<vmem>>, %arg4: memref<1x128xf32, #tpu.memory_space<vmem>>, %arg5: memref<1x128xf32, #tpu.memory_space<vmem>>, %arg6: memref<1x128xf32, #tpu.memory_space<vmem>>, %arg7: memref<1x1xf32, #tpu.memory_space<vmem>>, %arg8: memref<16x1xf32, #tpu.memory_space<vmem>>) attributes {dimension_semantics = [#tpu.dimension_semantics<parallel>], iteration_bounds = array<i64: 1>, scalar_prefetch = 0 : i64, scratch_operands = 0 : i64, tpu.core_type = #tpu.core_type<tc>, window_params = [{transform_indices = @transform_0, window_bounds = array<i64: 16, 576>}, {pipeline_mode = #tpu.pipeline_mode<synchronous>, transform_indices = @transform_1, window_bounds = array<i64: 576, 128>}, {pipeline_mode = #tpu.pipeline_mode<synchronous>, transform_indices = @transform_2, window_bounds = array<i64: 1, 128>}, {pipeline_mode = #tpu.pipeline_mode<synchronous>, transform_indices = @transform_3, window_bounds = array<i64: 1, 128>}, {pipeline_mode = #tpu.pipeline_mode<synchronous>, transform_indices = @transform_4, window_bounds = array<i64: 1, 128>}, {pipeline_mode = #tpu.pipeline_mode<synchronous>, transform_indices = @transform_5, window_bounds = array<i64: 1, 128>}, {pipeline_mode = #tpu.pipeline_mode<synchronous>, transform_indices = @transform_6, window_bounds = array<i64: 1, 1>}, {transform_indices = @transform_7, window_bounds = array<i64: 16, 1>}]} {
    %c0 = arith.constant 0 : index
    %c0_0 = arith.constant 0 : index
    %0 = vector.load %arg1[%c0, %c0_0] : memref<16x576xbf16, #tpu.memory_space<vmem>>, vector<16x576xbf16>
    %c0_1 = arith.constant 0 : index
    %c0_2 = arith.constant 0 : index
    %1 = vector.load %arg2[%c0_1, %c0_2] : memref<576x128xbf16, #tpu.memory_space<vmem>>, vector<576x128xbf16>
    %cst = arith.constant dense<0.000000e+00> : vector<16x128xf32>
    %2 = tpu.matmul %0, %1, %cst {dimension_numbers = #tpu.dot_dimension_numbers<[1], [0], [0], [1], [0, 0, 1, 1], [], []>} : vector<16x576xbf16>, vector<576x128xbf16>, vector<16x128xf32> -> vector<16x128xf32>
    %c0_3 = arith.constant 0 : index
    %c0_4 = arith.constant 0 : index
    %3 = vector.load %arg3[%c0_3, %c0_4] : memref<1x128xf32, #tpu.memory_space<vmem>>, vector<1x128xf32>
    %4 = vector.broadcast %3 : vector<1x128xf32> to vector<16x128xf32>
    %5 = arith.addf %2, %4 : vector<16x128xf32>
    %cst_5 = arith.constant 0.000000e+00 : f32
    %6 = vector.broadcast %cst_5 : f32 to vector<16x128xf32>
    %7 = arith.cmpf oge, %5, %6 : vector<16x128xf32>
    %cst_6 = arith.constant 2.000000e-01 : f32
    %8 = vector.broadcast %cst_6 : f32 to vector<16x128xf32>
    %9 = arith.mulf %8, %5 : vector<16x128xf32>
    %10 = arith.select %7, %5, %9 : vector<16x128xi1>, vector<16x128xf32>
    %c0_7 = arith.constant 0 : index
    %c0_8 = arith.constant 0 : index
    %11 = vector.load %arg4[%c0_7, %c0_8] : memref<1x128xf32, #tpu.memory_space<vmem>>, vector<1x128xf32>
    %12 = vector.broadcast %11 : vector<1x128xf32> to vector<16x128xf32>
    %13 = arith.mulf %10, %12 : vector<16x128xf32>
    %c0_9 = arith.constant 0 : index
    %c0_10 = arith.constant 0 : index
    %14 = vector.load %arg5[%c0_9, %c0_10] : memref<1x128xf32, #tpu.memory_space<vmem>>, vector<1x128xf32>
    %15 = vector.broadcast %14 : vector<1x128xf32> to vector<16x128xf32>
    %16 = arith.addf %13, %15 : vector<16x128xf32>
    %c0_11 = arith.constant 0 : index
    %c0_12 = arith.constant 0 : index
    %17 = vector.load %arg6[%c0_11, %c0_12] : memref<1x128xf32, #tpu.memory_space<vmem>>, vector<1x128xf32>
    %18 = vector.broadcast %17 : vector<1x128xf32> to vector<16x128xf32>
    %19 = arith.mulf %16, %18 : vector<16x128xf32>
    %cst_13 = arith.constant dense<0.000000e+00> : vector<16xf32>
    %20 = vector.multi_reduction <add>, %19, %cst_13 [1] : vector<16x128xf32> to vector<16xf32>
    %21 = vector.shape_cast %20 : vector<16xf32> to vector<16x1xf32>
    %c0_14 = arith.constant 0 : index
    %c0_15 = arith.constant 0 : index
    %22 = vector.load %arg7[%c0_14, %c0_15] : memref<1x1xf32, #tpu.memory_space<vmem>>, vector<1x1xf32>
    %23 = vector.broadcast %22 : vector<1x1xf32> to vector<16x1xf32>
    %24 = arith.addf %21, %23 : vector<16x1xf32>
    %cst_16 = arith.constant 0.000000e+00 : f32
    %25 = vector.broadcast %cst_16 : f32 to vector<16x1xf32>
    %26 = arith.subf %25, %24 : vector<16x1xf32>
    %27 = math.exp %26 : vector<16x1xf32>
    %cst_17 = arith.constant 1.000000e+00 : f32
    %28 = vector.broadcast %cst_17 : f32 to vector<16x1xf32>
    %29 = arith.addf %28, %27 : vector<16x1xf32>
    %30 = tpu.reciprocal %29 : vector<16x1xf32> -> vector<16x1xf32>
    %c0_18 = arith.constant 0 : index
    %c0_19 = arith.constant 0 : index
    %31 = vector.load %arg8[%c0_18, %c0_19] : memref<16x1xf32, #tpu.memory_space<vmem>>, vector<16x1xf32>
    tpu.vector_store %arg8[%c0_18, %c0_19], %30 {strides = array<i32>} : memref<16x1xf32, #tpu.memory_space<vmem>>, vector<16x1xf32>,
    return
  }
  func.func @transform_0(%arg0: i32) -> (i32, i32) {
    %c0_i32 = arith.constant 0 : i32
    %c0_i32_0 = arith.constant 0 : i32
    return %arg0, %c0_i32 : i32, i32
  }
  func.func @transform_1(%arg0: i32) -> (i32, i32) {
    %c0_i32 = arith.constant 0 : i32
    %c0_i32_0 = arith.constant 0 : i32
    %c0_i32_1 = arith.constant 0 : i32
    return %c0_i32, %c0_i32_0 : i32, i32
  }
  func.func @transform_2(%arg0: i32) -> (i32, i32) {
    %c0_i32 = arith.constant 0 : i32
    %c0_i32_0 = arith.constant 0 : i32
    %c0_i32_1 = arith.constant 0 : i32
    return %c0_i32, %c0_i32_0 : i32, i32
  }
  func.func @transform_3(%arg0: i32) -> (i32, i32) {
    %c0_i32 = arith.constant 0 : i32
    %c0_i32_0 = arith.constant 0 : i32
    %c0_i32_1 = arith.constant 0 : i32
    return %c0_i32, %c0_i32_0 : i32, i32
  }
  func.func @transform_4(%arg0: i32) -> (i32, i32) {
    %c0_i32 = arith.constant 0 : i32
    %c0_i32_0 = arith.constant 0 : i32
    %c0_i32_1 = arith.constant 0 : i32
    return %c0_i32, %c0_i32_0 : i32, i32
  }
  func.func @transform_5(%arg0: i32) -> (i32, i32) {
    %c0_i32 = arith.constant 0 : i32
    %c0_i32_0 = arith.constant 0 : i32
    %c0_i32_1 = arith.constant 0 : i32
    return %c0_i32, %c0_i32_0 : i32, i32
  }
  func.func @transform_6(%arg0: i32) -> (i32, i32) {
    %c0_i32 = arith.constant 0 : i32
    %c0_i32_0 = arith.constant 0 : i32
    %c0_i32_1 = arith.constant 0 : i32
    return %c0_i32, %c0_i32_0 : i32, i32
  }
  func.func @transform_7(%arg0: i32) -> (i32, i32) {
    %c0_i32 = arith.constant 0 : i32
    %c0_i32_0 = arith.constant 0 : i32
    return %arg0, %c0_i32 : i32, i32
  }
}

</mosaic_0001>

<bundles_post_ra>
// kernel: _lambda_.4
= control target key start
LH: loop header
LB: loop body
LE: loop exit
PB: predicated region body
PF: predicated region fallthrough
CT: control target
= control target key end

     0   :  { %vm121_vm0 = vcmask 1044480   ;;  %vm122_vm1 = vcmask 1045504   ;;  %v416_v2 = vmov 65535   ;;  %vm96_vm2 = vcmask 220160   ;;  %s575_s1 = inlined_call_operand.vmem [shape: bf16[27,128], index: 1, kind: input, shape index: {}]   ;;  %s576_s2 = inlined_call_operand.vmem [shape: f32[1,128], index: 2, kind: input, shape index: {}]   ;;  %s577_s3 = inlined_call_operand.vmem [shape: f32[1,128], index: 3, kind: input, shape index: {}]   ;;  %s578_s4 = inlined_call_operand.vmem [shape: f32[1,128], index: 4, kind: input, shape index: {}]   ;;  %s579_s0 = inlined_call_operand.vmem [shape: bf16[128,27], index: 0, kind: input, shape index: {}]   ;;  %s580_s5 = inlined_call_operand.vmem [shape: bf16[128,128], index: 5, kind: output, shape index: {}]  }
   0x1   :  { %v339_v0 = vld [vmem:[%s575_s1 + $0x8] sm:$0xf]  ;;  %v358_v1 = vld [vmem:[%s575_s1 + $0x8] sm:$0x30]  ;;  %v123_v3 = vsel %vm121_vm0, 4294967295, %v416_v2  ;;  %v357_v7 = vld [vmem:[%s575_s1] sm:$0xff] }
   0x2   :  { %v340_v4 = vor.u32 %v358_v1, %v339_v0  ;;  %v124_v5 = vsel %vm122_vm1, %v123_v3, 0  ;;  %v349_v8 = vld [vmem:[%s579_s0] sm:$0xff]  ;;  %v351_v9 = vld [vmem:[%s579_s0 + $0x10] sm:$0xff]  ;;  %v350_v12 = vld [vmem:[%s579_s0 + $0x8] sm:$0xff] }
   0x3   :  { %v353_v10 = vld [vmem:[%s579_s0 + $0x20] sm:$0xff]  ;;  %v355_v11 = vld [vmem:[%s579_s0 + $0x30] sm:$0xff]  ;;  %v352_v13 = vld [vmem:[%s579_s0 + $0x18] sm:$0xff] }
   0x4   :  { %v126_v6 = vand.u32 %v340_v4, %v124_v5  ;;  %v354_v14 = vld [vmem:[%s579_s0 + $0x28] sm:$0xff]  ;;  %v356_v15 = vld [vmem:[%s579_s0 + $0x38] sm:$0xff]  ;;  %v491_v16 = vld [vmem:[%s576_s2] ss:$0 sm:$0xff] }
   0x5   :  { %v498_v23 = vld [vmem:[%s577_s3] ss:$0 sm:$0xff] }
   0x6   :  { %134 = vmatpush.bf16.msra.mxu0 %v126_v6  ;;  %406 = vmatpush.bf16.msra.mxu1 %v126_v6  ;;  %v508_v35 = vld [vmem:[%s578_s4] ss:$0 sm:$0xff] }
   0x7   :  { %407 = vmatpush.bf16.msra.mxu2 %v126_v6  ;;  %408 = vmatpush.bf16.msra.mxu3 %v126_v6 }
   0xa   :  { %135 = vmatpush.bf16.msra.mxu0 %v357_v7  ;;  %409 = vmatpush.bf16.msra.mxu1 %v357_v7 }
   0xb   :  { %410 = vmatpush.bf16.msra.mxu2 %v357_v7  ;;  %411 = vmatpush.bf16.msra.mxu3 %v357_v7 }
   0xd   :  { %341 = vmatmul.msk.bf16.vlgmr.msra.gmra.mxu0 %vm96_vm2, %v349_v8  ;;  %343 = vmatmul.msk.bf16.vlgmr.msra.gmra.mxu1 %vm96_vm2, %v351_v9 }
   0xe   :  { %345 = vmatmul.msk.bf16.vlgmr.msra.gmra.mxu2 %vm96_vm2, %v353_v10  ;;  %347 = vmatmul.msk.bf16.vlgmr.msra.gmra.mxu3 %vm96_vm2, %v355_v11 }
  0x1d   :  { %342 = vmatmul.msk.bf16.gmra.mxu0 %vm96_vm2, %v350_v12  ;;  %344 = vmatmul.msk.bf16.gmra.mxu1 %vm96_vm2, %v352_v13 }
  0x1e   :  { %346 = vmatmul.msk.bf16.gmra.mxu2 %vm96_vm2, %v354_v14  ;;  %348 = vmatmul.msk.bf16.gmra.mxu3 %vm96_vm2, %v356_v15 }
  0x8a   :  { %v137_v17 = vpop.f32.mrf.mxu0  ;;  %v147_v18 = vpop.f32.mrf.mxu1 }
  0x8b   :  { %v138_v19 = vadd.f32 %v491_v16, %v137_v17  ;;  %v148_v20 = vadd.f32 %v491_v16, %v147_v18 }
  0x8d   :  { %v193_v21 = vmul.f32 0.2, %v138_v19  ;;  %v197_v22 = vmul.f32 0.2, %v148_v20  ;;  %vm177_vm3 = vcmp.ge.f32.partialorder %v138_v19, 0.0  ;;  %vm181_vm4 = vcmp.ge.f32.partialorder %v148_v20, 0.0 }
  0x8f   :  { %v209_v24 = vsel %vm177_vm3, %v138_v19, %v193_v21  ;;  %v213_v25 = vsel %vm181_vm4, %v148_v20, %v197_v22 }
  0x90   :  { %v229_v34 = vmul.f32 %v498_v23, %v209_v24  ;;  %v233_v36 = vmul.f32 %v498_v23, %v213_v25 }
  0x91   :  { %v157_v26 = vpop.f32.mrf.mxu2  ;;  %v167_v27 = vpop.f32.mrf.mxu3 }
  0x92   :  { %v158_v28 = vadd.f32 %v491_v16, %v157_v26  ;;  %v139_v29 = vpop.f32.mrf.mxu0  ;;  %v149_v30 = vpop.f32.mrf.mxu1  ;;  %v168_v31 = vadd.f32 %v491_v16, %v167_v27  ;;  %v249_v45 = vadd.f32 %v508_v35, %v229_v34  ;;  %v253_v46 = vadd.f32 %v508_v35, %v233_v36 }
  0x93   :  { %v140_v32 = vadd.f32 %v491_v16, %v139_v29  ;;  %v150_v33 = vadd.f32 %v491_v16, %v149_v30 }
  0x94   :  { %v201_v37 = vmul.f32 0.2, %v158_v28  ;;  %vm185_vm7 = vcmp.ge.f32.partialorder %v158_v28, 0.0  ;;  %v205_v40 = vmul.f32 0.2, %v168_v31  ;;  %vm189_vm8 = vcmp.ge.f32.partialorder %v168_v31, 0.0 }
  0x95   :  { %vm178_vm5 = vcmp.ge.f32.partialorder %v140_v32, 0.0  ;;  %v194_v38 = vmul.f32 0.2, %v140_v32  ;;  %vm182_vm6 = vcmp.ge.f32.partialorder %v150_v33, 0.0  ;;  %v198_v39 = vmul.f32 0.2, %v150_v33 }
  0x96   :  { %v217_v47 = vsel %vm185_vm7, %v158_v28, %v201_v37  ;;  %v221_v56 = vsel %vm189_vm8, %v168_v31, %v205_v40 }
  0x97   :  { %v210_v41 = vsel %vm178_vm5, %v140_v32, %v194_v38  ;;  %v214_v42 = vsel %vm182_vm6, %v150_v33, %v198_v39  ;;  %v237_v62 = vmul.f32 %v498_v23, %v217_v47  ;;  %v241_v0 = vmul.f32 %v498_v23, %v221_v56 }
  0x98   :  { %v230_v43 = vmul.f32 %v498_v23, %v210_v41  ;;  %v234_v44 = vmul.f32 %v498_v23, %v214_v42 }
  0x99   :  { %v159_v48 = vpop.f32.mrf.mxu2  ;;  %v169_v49 = vpop.f32.mrf.mxu3  ;;  %v257_v7 = vadd.f32 %v508_v35, %v237_v62  ;;  %v261_v11 = vadd.f32 %v508_v35, %v241_v0 }
  0x9a   :  { %v250_v50 = vadd.f32 %v508_v35, %v230_v43  ;;  %v254_v51 = vadd.f32 %v508_v35, %v234_v44  ;;  %v160_v52 = vadd.f32 %v491_v16, %v159_v48  ;;  %v170_v53 = vadd.f32 %v491_v16, %v169_v49  ;;  %v142_v54 = vpop.f32.mrf.mxu0  ;;  %v152_v55 = vpop.f32.mrf.mxu1 }
  0x9b   :  { %v143_v57 = vadd.f32 %v491_v16, %v142_v54  ;;  %v153_v58 = vadd.f32 %v491_v16, %v152_v55 }
  0x9c   :  { %v362_v59 = vpack.c.bf16 %v250_v50, %v249_v45  ;;  %v372_v60 = vpack.c.bf16 %v254_v51, %v253_v46  ;;  %vm186_vm9 = vcmp.ge.f32.partialorder %v160_v52, 0.0  ;;  %v202_v61 = vmul.f32 0.2, %v160_v52 }
  0x9d   :  { %vm190_vm10 = vcmp.ge.f32.partialorder %v170_v53, 0.0  ;;  %v206_v63 = vmul.f32 0.2, %v170_v53  ;;  %v195_v2 = vmul.f32 0.2, %v143_v57  ;;  %vm179_vm11 = vcmp.ge.f32.partialorder %v143_v57, 0.0 }
  0x9e   :  { %363 = vst [vmem:[%s580_s5] sm:$0xff] %v362_v59   ;;  %v218_v1 = vsel %vm186_vm9, %v160_v52, %v202_v61  ;;  %v199_v6 = vmul.f32 0.2, %v153_v58  ;;  %vm183_vm12 = vcmp.ge.f32.partialorder %v153_v58, 0.0 }
  0x9f   :  { %400 = vst [vmem:[%s580_s5 + $0x10] sm:$0xff] %v372_v60   ;;  %v238_v3 = vmul.f32 %v498_v23, %v218_v1  ;;  %v222_v4 = vsel %vm190_vm10, %v170_v53, %v206_v63  ;;  %v211_v13 = vsel %vm179_vm11, %v143_v57, %v195_v2 }
  0xa0   :  { %v242_v5 = vmul.f32 %v498_v23, %v222_v4  ;;  %v215_v24 = vsel %vm183_vm12, %v153_v58, %v199_v6  ;;  %v231_v25 = vmul.f32 %v498_v23, %v211_v13 }
  0xa1   :  { %v258_v8 = vadd.f32 %v508_v35, %v238_v3  ;;  %v162_v9 = vpop.f32.mrf.mxu2  ;;  %v172_v10 = vpop.f32.mrf.mxu3  ;;  %v235_v29 = vmul.f32 %v498_v23, %v215_v24 }
  0xa2   :  { %v262_v12 = vadd.f32 %v508_v35, %v242_v5  ;;  %v163_v14 = vadd.f32 %v491_v16, %v162_v9  ;;  %v144_v15 = vpop.f32.mrf.mxu0  ;;  %v154_v17 = vpop.f32.mrf.mxu1  ;;  %v173_v19 = vadd.f32 %v491_v16, %v172_v10  ;;  %v251_v34 = vadd.f32 %v508_v35, %v231_v25 }
  0xa3   :  { %v382_v18 = vpack.c.bf16 %v258_v8, %v257_v7  ;;  %v145_v20 = vadd.f32 %v491_v16, %v144_v15  ;;  %v155_v21 = vadd.f32 %v491_v16, %v154_v17  ;;  %v255_v43 = vadd.f32 %v508_v35, %v235_v29 }
  0xa4   :  { %v392_v22 = vpack.c.bf16 %v262_v12, %v261_v11  ;;  %v203_v27 = vmul.f32 0.2, %v163_v14  ;;  %vm187_vm15 = vcmp.ge.f32.partialorder %v163_v14, 0.0  ;;  %v207_v30 = vmul.f32 0.2, %v173_v19 }
  0xa5   :  { %402 = vst [vmem:[%s580_s5 + $0x20] sm:$0xff] %v382_v18   ;;  %vm180_vm13 = vcmp.ge.f32.partialorder %v145_v20, 0.0  ;;  %v196_v26 = vmul.f32 0.2, %v145_v20  ;;  %vm184_vm14 = vcmp.ge.f32.partialorder %v155_v21, 0.0  ;;  %vm191_vm0 = vcmp.ge.f32.partialorder %v173_v19, 0.0 }
  0xa6   :  { %404 = vst [vmem:[%s580_s5 + $0x30] sm:$0xff] %v392_v22   ;;  %v200_v28 = vmul.f32 0.2, %v155_v21  ;;  %v219_v39 = vsel %vm187_vm15, %v163_v14, %v203_v27  ;;  %v223_v44 = vsel %vm191_vm0, %v173_v19, %v207_v30 }
  0xa7   :  { %v212_v31 = vsel %vm180_vm13, %v145_v20, %v196_v26  ;;  %v239_v48 = vmul.f32 %v498_v23, %v219_v39  ;;  %v243_v51 = vmul.f32 %v498_v23, %v223_v44 }
  0xa8   :  { %v232_v32 = vmul.f32 %v498_v23, %v212_v31  ;;  %v216_v33 = vsel %vm184_vm14, %v155_v21, %v200_v28 }
  0xa9   :  { %v236_v36 = vmul.f32 %v498_v23, %v216_v33  ;;  %v164_v37 = vpop.f32.mrf.mxu2  ;;  %v174_v38 = vpop.f32.mrf.mxu3  ;;  %v259_v55 = vadd.f32 %v508_v35, %v239_v48  ;;  %v263_v57 = vadd.f32 %v508_v35, %v243_v51 }
  0xaa   :  { %v252_v40 = vadd.f32 %v508_v35, %v232_v32  ;;  %v165_v41 = vadd.f32 %v491_v16, %v164_v37  ;;  %v175_v42 = vadd.f32 %v491_v16, %v174_v38 }
  0xab   :  { %v256_v45 = vadd.f32 %v508_v35, %v236_v36 }
  0xac   :  { %v367_v46 = vpack.c.bf16 %v252_v40, %v251_v34  ;;  %vm188_vm1 = vcmp.ge.f32.partialorder %v165_v41, 0.0  ;;  %v204_v47 = vmul.f32 0.2, %v165_v41  ;;  %vm192_vm2 = vcmp.ge.f32.partialorder %v175_v42, 0.0 }
  0xad   :  { %v377_v49 = vpack.c.bf16 %v256_v45, %v255_v43  ;;  %v208_v50 = vmul.f32 0.2, %v175_v42 }
  0xae   :  { %399 = vst [vmem:[%s580_s5 + $0x8] sm:$0xff] %v367_v46   ;;  %v220_v16 = vsel %vm188_vm1, %v165_v41, %v204_v47 }
  0xaf   :  { %401 = vst [vmem:[%s580_s5 + $0x18] sm:$0xff] %v377_v49   ;;  %v240_v52 = vmul.f32 %v498_v23, %v220_v16  ;;  %v224_v53 = vsel %vm192_vm2, %v175_v42, %v208_v50 }
  0xb0   :  { %v244_v54 = vmul.f32 %v498_v23, %v224_v53 }
  0xb1   :  { %v260_v56 = vadd.f32 %v508_v35, %v240_v52 }
  0xb2   :  { %v264_v58 = vadd.f32 %v508_v35, %v244_v54 }
  0xb3   :  { %v387_v59 = vpack.c.bf16 %v260_v56, %v259_v55 }
  0xb4   :  { %v397_v60 = vpack.c.bf16 %v264_v58, %v263_v57 }
  0xb5   :  { %403 = vst [vmem:[%s580_s5 + $0x28] sm:$0xff] %v387_v59  }
  0xb6   :  { %405 = vst [vmem:[%s580_s5 + $0x38] sm:$0xff] %v397_v60  }

// kernel: _lambda_.5
= control target key start
LH: loop header
LB: loop body
LE: loop exit
PB: predicated region body
PF: predicated region fallthrough
CT: control target
= control target key end

     0   :  { %vm119_vm0 = vcmask 130048   ;;  %s391_s1 = inlined_call_operand.vmem [shape: bf16[144,128], index: 1, kind: input, shape index: {}]   ;;  %s392_s0 = inlined_call_operand.vmem [shape: bf16[32,144], index: 0, kind: input, shape index: {}]   ;;  %s393_s2 = inlined_call_operand.vmem [shape: f32[1,128], index: 2, kind: input, shape index: {}]   ;;  %s394_s3 = inlined_call_operand.vmem [shape: f32[1,128], index: 3, kind: input, shape index: {}]   ;;  %s395_s4 = inlined_call_operand.vmem [shape: f32[1,128], index: 4, kind: input, shape index: {}]   ;;  %s396_s5 = inlined_call_operand.vmem [shape: bf16[32,128], index: 5, kind: output, shape index: {}]  }
   0x1   :  { %v269_v0 = vld [vmem:[%s391_s1 + $0x38] sm:$0xff]  ;;  %v270_v1 = vld [vmem:[%s391_s1 + $0x40] sm:$0xff]  ;;  %v268_v3 = vld [vmem:[%s391_s1 + $0x30] sm:$0xff] }
   0x2   :  { %v258_v2 = vld [vmem:[%s392_s0 + $0x4] sm:$0xf]  ;;  %126 = vmatpush.bf16.msra.mxu0 %v269_v0  ;;  %282 = vmatpush.bf16.msra.mxu2 %v269_v0  ;;  %v208_v4 = vld [vmem:[%s392_s0 + $0x8] sm:$0xf0]  ;;  %v265_v8 = vld [vmem:[%s391_s1 + $0x18] sm:$0xff] }
   0x3   :  { %152 = vmatpush.bf16.msra.mxu1 %v270_v1  ;;  %v211_v5 = vor.u32 %v258_v2, %v208_v4  ;;  %v267_v6 = vld [vmem:[%s391_s1 + $0x28] sm:$0xff]  ;;  %v266_v7 = vld [vmem:[%s391_s1 + $0x20] sm:$0xff]  ;;  %v260_v9 = vld [vmem:[%s392_s0 + $0x14] sm:$0xf] }
   0x4   :  { %v216_v10 = vld [vmem:[%s392_s0 + $0x18] sm:$0xf0]  ;;  %v264_v11 = vld [vmem:[%s391_s1 + $0x10] sm:$0xff]  ;;  %v263_v13 = vld [vmem:[%s391_s1 + $0x8] sm:$0xff] }
   0x5   :  { %v219_v12 = vor.u32 %v260_v9, %v216_v10  ;;  %v262_v14 = vld [vmem:[%s391_s1] sm:$0xff]  ;;  %v259_v16 = vld [vmem:[%s392_s0 + $0x4] sm:$0xf0]  ;;  %v214_v17 = vld [vmem:[%s392_s0 + $0x10] sm:$0xf] }
   0x6   :  { %127 = vmatpush.bf16.msra.mxu0 %v268_v3  ;;  %283 = vmatpush.bf16.msra.mxu2 %v268_v3  ;;  %v206_v15 = vld [vmem:[%s392_s0] sm:$0xf]  ;;  %v261_v18 = vld [vmem:[%s392_s0 + $0x14] sm:$0xf0] }
   0x7   :  { %256 = vmatmul.msk.bf16.vlgmr.msra.gmra.mxu1 %vm119_vm0, %v211_v5  ;;  %v207_v19 = vor.u32 %v259_v16, %v206_v15  ;;  %v215_v20 = vor.u32 %v261_v18, %v214_v17  ;;  %v290_v23 = vld [vmem:[%s393_s2] ss:$0 sm:$0xff] }
   0x8   :  { %v291_v34 = vld [vmem:[%s394_s3] ss:$0 sm:$0xff] }
   0x9   :  { %v292_v40 = vld [vmem:[%s395_s4] ss:$0 sm:$0xff] }
   0xa   :  { %128 = vmatpush.bf16.msra.mxu0 %v267_v6  ;;  %284 = vmatpush.bf16.msra.mxu2 %v267_v6 }
   0xe   :  { %129 = vmatpush.bf16.msra.mxu0 %v266_v7  ;;  %285 = vmatpush.bf16.msra.mxu2 %v266_v7 }
  0x12   :  { %130 = vmatpush.bf16.msra.mxu0 %v265_v8  ;;  %286 = vmatpush.bf16.msra.mxu2 %v265_v8 }
  0x16   :  { %131 = vmatpush.bf16.msra.mxu0 %v264_v11  ;;  %287 = vmatpush.bf16.msra.mxu2 %v264_v11 }
  0x17   :  { %257 = vmatmul.msk.bf16.gmra.mxu1 %vm119_vm0, %v219_v12 }
  0x1a   :  { %132 = vmatpush.bf16.msra.mxu0 %v263_v13  ;;  %288 = vmatpush.bf16.msra.mxu2 %v263_v13 }
  0x1e   :  { %133 = vmatpush.bf16.msra.mxu0 %v262_v14  ;;  %289 = vmatpush.bf16.msra.mxu2 %v262_v14 }
  0x21   :  { %134 = vmatmul.bf16.vlgmr.msra.gmra.mxu0 %v207_v19  ;;  %139 = vmatmul.bf16.vlgmr.msra.gmra.mxu2 %v215_v20 }
  0x84   :  { %v154_v21 = vpop.f32.mrf.mxu1 }
  0x8c   :  { %v156_v22 = vpop.f32.mrf.mxu1 }
  0x94   :  { %v159_v27 = vpop.f32.mrf.mxu1 }
  0x9c   :  { %v161_v45 = vpop.f32.mrf.mxu1 }
  0x9e   :  { %v135_v24 = vpop.f32.mrf.mxu0 }
  0x9f   :  { %v136_v25 = vadd.f32 %v290_v23, %v135_v24 }
  0xa1   :  { %v155_v26 = vadd.f32 %v154_v21, %v136_v25 }
  0xa3   :  { %v168_v29 = vmul.f32 0.2, %v155_v26  ;;  %vm164_vm1 = vcmp.ge.f32.partialorder %v155_v26, 0.0 }
  0xa4   :  { %v140_v28 = vpop.f32.mrf.mxu2 }
  0xa5   :  { %v141_v30 = vadd.f32 %v290_v23, %v140_v28  ;;  %v172_v35 = vsel %vm164_vm1, %v155_v26, %v168_v29 }
  0xa6   :  { %v137_v31 = vpop.f32.mrf.mxu0  ;;  %v180_v39 = vmul.f32 %v291_v34, %v172_v35 }
  0xa7   :  { %v160_v32 = vadd.f32 %v159_v27, %v141_v30  ;;  %v138_v33 = vadd.f32 %v290_v23, %v137_v31 }
  0xa8   :  { %v188_v48 = vadd.f32 %v292_v40, %v180_v39 }
  0xa9   :  { %v157_v36 = vadd.f32 %v156_v22, %v138_v33  ;;  %v170_v37 = vmul.f32 0.2, %v160_v32  ;;  %vm166_vm3 = vcmp.ge.f32.partialorder %v160_v32, 0.0 }
  0xab   :  { %vm165_vm2 = vcmp.ge.f32.partialorder %v157_v36, 0.0  ;;  %v169_v38 = vmul.f32 0.2, %v157_v36  ;;  %v174_v46 = vsel %vm166_vm3, %v160_v32, %v170_v37 }
  0xac   :  { %v142_v41 = vpop.f32.mrf.mxu2  ;;  %v182_v51 = vmul.f32 %v291_v34, %v174_v46 }
  0xad   :  { %v173_v42 = vsel %vm165_vm2, %v157_v36, %v169_v38  ;;  %v143_v43 = vadd.f32 %v290_v23, %v142_v41 }
  0xae   :  { %v181_v44 = vmul.f32 %v291_v34, %v173_v42  ;;  %v190_v55 = vadd.f32 %v292_v40, %v182_v51 }
  0xaf   :  { %v162_v47 = vadd.f32 %v161_v45, %v143_v43 }
  0xb0   :  { %v189_v49 = vadd.f32 %v292_v40, %v181_v44 }
  0xb1   :  { %vm167_vm4 = vcmp.ge.f32.partialorder %v162_v47, 0.0  ;;  %v171_v50 = vmul.f32 0.2, %v162_v47 }
  0xb2   :  { %v274_v52 = vpack.c.bf16 %v189_v49, %v188_v48 }
  0xb3   :  { %v175_v53 = vsel %vm167_vm4, %v162_v47, %v171_v50 }
  0xb4   :  { %275 = vst [vmem:[%s396_s5] sm:$0xff] %v274_v52   ;;  %v183_v54 = vmul.f32 %v291_v34, %v175_v53 }
  0xb6   :  { %v191_v56 = vadd.f32 %v292_v40, %v183_v54 }
  0xb8   :  { %v279_v57 = vpack.c.bf16 %v191_v56, %v190_v55 }
  0xba   :  { %281 = vst [vmem:[%s396_s5 + $0x8] sm:$0xff] %v279_v57  }

// kernel: _lambda_.6
= control target key start
LH: loop header
LB: loop body
LE: loop exit
PB: predicated region body
PF: predicated region fallthrough
CT: control target
= control target key end

     0   :  { %vm188_vm0 = vcmask 261120   ;;  %s488_s1 = inlined_call_operand.vmem [shape: bf16[288,128], index: 1, kind: input, shape index: {}]   ;;  %s489_s0 = inlined_call_operand.vmem [shape: bf16[16,288], index: 0, kind: input, shape index: {}]   ;;  %s490_s2 = inlined_call_operand.vmem [shape: f32[1,128], index: 2, kind: input, shape index: {}]   ;;  %s491_s3 = inlined_call_operand.vmem [shape: f32[1,128], index: 3, kind: input, shape index: {}]   ;;  %s492_s4 = inlined_call_operand.vmem [shape: f32[1,128], index: 4, kind: input, shape index: {}]   ;;  %s493_s5 = inlined_call_operand.vmem [shape: bf16[16,128], index: 5, kind: output, shape index: {}]  }
   0x1   :  { %v355_v0 = vld [vmem:[%s488_s1 + $0x38] sm:$0xff]  ;;  %v354_v2 = vld [vmem:[%s488_s1 + $0x30] sm:$0xff]  ;;  %v365_v4 = vld [vmem:[%s488_s1 + $0x88] sm:$0xff] }
   0x2   :  { %v363_v1 = vld [vmem:[%s488_s1 + $0x78] sm:$0xff]  ;;  %192 = vmatpush.bf16.msra.mxu0 %v355_v0  ;;  %v362_v3 = vld [vmem:[%s488_s1 + $0x70] sm:$0xff]  ;;  %226 = vmatpush.bf16.msra.mxu2 %v365_v4  ;;  %v364_v5 = vld [vmem:[%s488_s1 + $0x80] sm:$0xff] }
   0x3   :  { %206 = vmatpush.bf16.msra.mxu1 %v363_v1  ;;  %v270_v6 = vld [vmem:[%s489_s0 + $0x8] sm:$0xf]  ;;  %v347_v7 = vld [vmem:[%s489_s0 + $0x10] sm:$0xf0]  ;;  %v352_v11 = vld [vmem:[%s488_s1 + $0x20] sm:$0xff] }
   0x4   :  { %v353_v8 = vld [vmem:[%s488_s1 + $0x28] sm:$0xff]  ;;  %v271_v10 = vor.u32 %v347_v7, %v270_v6  ;;  %v360_v12 = vld [vmem:[%s488_s1 + $0x60] sm:$0xff]  ;;  %v351_v13 = vld [vmem:[%s488_s1 + $0x18] sm:$0xff] }
   0x5   :  { %v361_v9 = vld [vmem:[%s488_s1 + $0x68] sm:$0xff]  ;;  %v359_v14 = vld [vmem:[%s488_s1 + $0x58] sm:$0xff]  ;;  %v350_v15 = vld [vmem:[%s488_s1 + $0x10] sm:$0xff] }
   0x6   :  { %193 = vmatpush.bf16.msra.mxu0 %v354_v2  ;;  %227 = vmatpush.bf16.msra.mxu2 %v364_v5  ;;  %v358_v16 = vld [vmem:[%s488_s1 + $0x50] sm:$0xff]  ;;  %v349_v17 = vld [vmem:[%s488_s1 + $0x8] sm:$0xff]  ;;  %v348_v19 = vld [vmem:[%s488_s1] sm:$0xff] }
   0x7   :  { %207 = vmatpush.bf16.msra.mxu1 %v362_v3  ;;  %v357_v18 = vld [vmem:[%s488_s1 + $0x48] sm:$0xff]  ;;  %v356_v20 = vld [vmem:[%s488_s1 + $0x40] sm:$0xff]  ;;  %v264_v24 = vld [vmem:[%s489_s0 + $0xc] sm:$0xf0] }
   0x8   :  { %v262_v21 = vld [vmem:[%s489_s0] sm:$0xf]  ;;  %v346_v22 = vld [vmem:[%s489_s0 + $0x8] sm:$0xf0]  ;;  %v345_v23 = vld [vmem:[%s489_s0 + $0x4] sm:$0xf] }
   0x9   :  { %344 = vmatmul.msk.bf16.vlgmr.msra.gmra.mxu2 %vm188_vm0, %v271_v10  ;;  %v263_v25 = vor.u32 %v346_v22, %v262_v21  ;;  %v267_v26 = vor.u32 %v345_v23, %v264_v24  ;;  %v371_v27 = vld [vmem:[%s490_s2] ss:$0 sm:$0xff] }
   0xa   :  { %194 = vmatpush.bf16.msra.mxu0 %v353_v8  ;;  %v372_v39 = vld [vmem:[%s491_s3] ss:$0 sm:$0xff] }
   0xb   :  { %208 = vmatpush.bf16.msra.mxu1 %v361_v9  ;;  %v373_v45 = vld [vmem:[%s492_s4] ss:$0 sm:$0xff] }
   0xe   :  { %195 = vmatpush.bf16.msra.mxu0 %v352_v11 }
   0xf   :  { %209 = vmatpush.bf16.msra.mxu1 %v360_v12 }
  0x12   :  { %196 = vmatpush.bf16.msra.mxu0 %v351_v13 }
  0x13   :  { %210 = vmatpush.bf16.msra.mxu1 %v359_v14 }
  0x16   :  { %197 = vmatpush.bf16.msra.mxu0 %v350_v15 }
  0x17   :  { %211 = vmatpush.bf16.msra.mxu1 %v358_v16 }
  0x1a   :  { %198 = vmatpush.bf16.msra.mxu0 %v349_v17 }
  0x1b   :  { %212 = vmatpush.bf16.msra.mxu1 %v357_v18 }
  0x1e   :  { %199 = vmatpush.bf16.msra.mxu0 %v348_v19 }
  0x1f   :  { %213 = vmatpush.bf16.msra.mxu1 %v356_v20 }
  0x21   :  { %200 = vmatmul.bf16.vlgmr.msra.gmra.mxu0 %v263_v25 }
  0x22   :  { %214 = vmatmul.bf16.vlgmr.msra.gmra.mxu1 %v267_v26 }
  0x8c   :  { %v229_v31 = vpop.f32.mrf.mxu2 }
  0x94   :  { %v231_v40 = vpop.f32.mrf.mxu2 }
  0x9e   :  { %v201_v28 = vpop.f32.mrf.mxu0 }
  0x9f   :  { %v215_v29 = vpop.f32.mrf.mxu1  ;;  %v202_v30 = vadd.f32 %v371_v27, %v201_v28 }
  0xa1   :  { %v216_v32 = vadd.f32 %v215_v29, %v202_v30 }
  0xa3   :  { %v230_v33 = vadd.f32 %v229_v31, %v216_v32 }
  0xa5   :  { %v236_v35 = vmul.f32 0.2, %v230_v33  ;;  %vm234_vm1 = vcmp.ge.f32.partialorder %v230_v33, 0.0 }
  0xa6   :  { %v203_v34 = vpop.f32.mrf.mxu0 }
  0xa7   :  { %v204_v36 = vadd.f32 %v371_v27, %v203_v34  ;;  %v217_v37 = vpop.f32.mrf.mxu1  ;;  %v238_v41 = vsel %vm234_vm1, %v230_v33, %v236_v35 }
  0xa8   :  { %v244_v44 = vmul.f32 %v372_v39, %v238_v41 }
  0xa9   :  { %v218_v38 = vadd.f32 %v217_v37, %v204_v36 }
  0xaa   :  { %v250_v48 = vadd.f32 %v373_v45, %v244_v44 }
  0xab   :  { %v232_v42 = vadd.f32 %v231_v40, %v218_v38 }
  0xad   :  { %vm235_vm2 = vcmp.ge.f32.partialorder %v232_v42, 0.0  ;;  %v237_v43 = vmul.f32 0.2, %v232_v42 }
  0xaf   :  { %v239_v46 = vsel %vm235_vm2, %v232_v42, %v237_v43 }
  0xb0   :  { %v245_v47 = vmul.f32 %v372_v39, %v239_v46 }
  0xb2   :  { %v251_v49 = vadd.f32 %v373_v45, %v245_v47 }
  0xb4   :  { %v369_v50 = vpack.c.bf16 %v251_v49, %v250_v48 }
  0xb6   :  { %370 = vst [vmem:[%s493_s5] sm:$0xff] %v369_v50  }

// kernel: _lambda_.7
= control target key start
LH: loop header
LB: loop body
LE: loop exit
PB: predicated region body
PF: predicated region fallthrough
CT: control target
= control target key end

     0   :  { %vm352_vm0 = vcmask 523264   ;;  %vm496_vm5 = vcmask 7168   ;;  %s923_s1 = inlined_call_operand.vmem [shape: bf16[576,128], index: 1, kind: input, shape index: {}]   ;;  %s924_s2 = inlined_call_operand.vmem [shape: f32[1,128], index: 2, kind: input, shape index: {}]   ;;  %s925_s0 = inlined_call_operand.vmem [shape: bf16[16,576], index: 0, kind: input, shape index: {}]   ;;  %s926_s3 = inlined_call_operand.vmem [shape: f32[1,128], index: 3, kind: input, shape index: {}]   ;;  %s927_s4 = inlined_call_operand.vmem [shape: f32[1,128], index: 4, kind: input, shape index: {}]   ;;  %s928_s5 = inlined_call_operand.vmem [shape: f32[1,128], index: 5, kind: input, shape index: {}]   ;;  %s929_s6 = inlined_call_operand.<no memory space> [shape: f32[1,1], index: 6, kind: input, shape index: {}]   ;;  %s930_s7 = inlined_call_operand.vmem [shape: f32[16,1], index: 7, kind: output, shape index: {}]  }
   0x1   :  { %v680_v0 = vld [vmem:[%s923_s1 + $0x38] sm:$0xff]  ;;  %v679_v4 = vld [vmem:[%s923_s1 + $0x30] sm:$0xff]  ;;  %v678_v8 = vld [vmem:[%s923_s1 + $0x28] sm:$0xff]  ;;  %v12_v54 = vstv %s929_s6 }
   0x2   :  { %v696_v1 = vld [vmem:[%s923_s1 + $0xb8] sm:$0xff]  ;;  %356 = vmatpush.bf16.msra.mxu0 %v680_v0  ;;  %v695_v5 = vld [vmem:[%s923_s1 + $0xb0] sm:$0xff]  ;;  %v694_v9 = vld [vmem:[%s923_s1 + $0xa8] sm:$0xff]  ;;  %13 = vst [vmem:[#allocation2] sm:$0x1] %v12_v54 }
   0x3   :  { %v704_v2 = vld [vmem:[%s923_s1 + $0xf8] sm:$0xff]  ;;  %384 = vmatpush.bf16.msra.mxu2 %v696_v1  ;;  %v703_v6 = vld [vmem:[%s923_s1 + $0xf0] sm:$0xff]  ;;  %v702_v10 = vld [vmem:[%s923_s1 + $0xe8] sm:$0xff] }
   0x4   :  { %v688_v3 = vld [vmem:[%s923_s1 + $0x78] sm:$0xff]  ;;  %398 = vmatpush.bf16.msra.mxu3 %v704_v2  ;;  %v687_v7 = vld [vmem:[%s923_s1 + $0x70] sm:$0xff]  ;;  %v686_v11 = vld [vmem:[%s923_s1 + $0x68] sm:$0xff] }
   0x5   :  { %370 = vmatpush.bf16.msra.mxu1 %v688_v3  ;;  %v677_v12 = vld [vmem:[%s923_s1 + $0x20] sm:$0xff]  ;;  %v676_v16 = vld [vmem:[%s923_s1 + $0x18] sm:$0xff]  ;;  %v675_v20 = vld [vmem:[%s923_s1 + $0x10] sm:$0xff] }
   0x6   :  { %357 = vmatpush.bf16.msra.mxu0 %v679_v4  ;;  %v693_v13 = vld [vmem:[%s923_s1 + $0xa0] sm:$0xff]  ;;  %v692_v17 = vld [vmem:[%s923_s1 + $0x98] sm:$0xff]  ;;  %v691_v21 = vld [vmem:[%s923_s1 + $0x90] sm:$0xff] }
   0x7   :  { %385 = vmatpush.bf16.msra.mxu2 %v695_v5  ;;  %v701_v14 = vld [vmem:[%s923_s1 + $0xe0] sm:$0xff]  ;;  %v700_v18 = vld [vmem:[%s923_s1 + $0xd8] sm:$0xff]  ;;  %v699_v22 = vld [vmem:[%s923_s1 + $0xd0] sm:$0xff] }
   0x8   :  { %399 = vmatpush.bf16.msra.mxu3 %v703_v6  ;;  %v685_v15 = vld [vmem:[%s923_s1 + $0x60] sm:$0xff]  ;;  %v684_v19 = vld [vmem:[%s923_s1 + $0x58] sm:$0xff]  ;;  %v683_v23 = vld [vmem:[%s923_s1 + $0x50] sm:$0xff] }
   0x9   :  { %371 = vmatpush.bf16.msra.mxu1 %v687_v7  ;;  %v674_v24 = vld [vmem:[%s923_s1 + $0x8] sm:$0xff]  ;;  %v673_v28 = vld [vmem:[%s923_s1] sm:$0xff]  ;;  %v670_v33 = vld [vmem:[%s925_s0 + $0x10] sm:$0xf0] }
   0xa   :  { %358 = vmatpush.bf16.msra.mxu0 %v678_v8  ;;  %v690_v25 = vld [vmem:[%s923_s1 + $0x88] sm:$0xff]  ;;  %v689_v29 = vld [vmem:[%s923_s1 + $0x80] sm:$0xff]  ;;  %v671_v35 = vld [vmem:[%s925_s0 + $0x18] sm:$0xf0] }
   0xb   :  { %386 = vmatpush.bf16.msra.mxu2 %v694_v9  ;;  %v698_v26 = vld [vmem:[%s923_s1 + $0xc8] sm:$0xff]  ;;  %v697_v30 = vld [vmem:[%s923_s1 + $0xc0] sm:$0xff]  ;;  %v507_v39 = vld [vmem:[%s925_s0 + $0x14] sm:$0xf0] }
   0xc   :  { %400 = vmatpush.bf16.msra.mxu3 %v702_v10  ;;  %v682_v27 = vld [vmem:[%s923_s1 + $0x48] sm:$0xff]  ;;  %v681_v31 = vld [vmem:[%s923_s1 + $0x40] sm:$0xff]  ;;  %v708_v40 = vld [vmem:[%s923_s1 + $0x118] sm:$0xff] }
   0xd   :  { %372 = vmatpush.bf16.msra.mxu1 %v686_v11  ;;  %v505_v32 = vld [vmem:[%s925_s0] sm:$0xf]  ;;  %v513_v34 = vld [vmem:[%s925_s0 + $0x8] sm:$0xf]  ;;  %v669_v36 = vld [vmem:[%s925_s0 + $0xc] sm:$0xf] }
   0xe   :  { %359 = vmatpush.bf16.msra.mxu0 %v677_v12  ;;  %v515_v37 = vld [vmem:[%s925_s0 + $0x1c] sm:$0xf0]  ;;  %v668_v38 = vld [vmem:[%s925_s0 + $0x4] sm:$0xf]  ;;  %v506_v41 = vor.u32 %v670_v33, %v505_v32  ;;  %v514_v42 = vor.u32 %v671_v35, %v513_v34  ;;  %v707_v45 = vld [vmem:[%s923_s1 + $0x110] sm:$0xff] }
   0xf   :  { %387 = vmatpush.bf16.msra.mxu2 %v693_v13  ;;  %v518_v43 = vor.u32 %v669_v36, %v515_v37  ;;  %v510_v44 = vor.u32 %v668_v38, %v507_v39  ;;  %v706_v46 = vld [vmem:[%s923_s1 + $0x108] sm:$0xff]  ;;  %v705_v47 = vld [vmem:[%s923_s1 + $0x100] sm:$0xff]  ;;  %v521_v48 = vld [vmem:[%s925_s0 + $0x10] sm:$0xf] }
  0x10   :  { %401 = vmatpush.bf16.msra.mxu3 %v701_v14  ;;  %v672_v49 = vld [vmem:[%s925_s0 + $0x20] sm:$0xf0]  ;;  %v709_v52 = vld [vmem:[%s924_s2] ss:$0 sm:$0xff] }
  0x11   :  { %373 = vmatpush.bf16.msra.mxu1 %v685_v15  ;;  %v522_v50 = vor.u32 %v672_v49, %v521_v48  ;;  %v710_v4 = vld [vmem:[%s926_s3] ss:$0 sm:$0xff] }
  0x12   :  { %360 = vmatpush.bf16.msra.mxu0 %v676_v16  ;;  %v711_v7 = vld [vmem:[%s927_s4] ss:$0 sm:$0xff] }
  0x13   :  { %388 = vmatpush.bf16.msra.mxu2 %v692_v17  ;;  %v712_v11 = vld [vmem:[%s928_s5] ss:$0 sm:$0xff] }
  0x14   :  { %402 = vmatpush.bf16.msra.mxu3 %v700_v18 }
  0x15   :  { %374 = vmatpush.bf16.msra.mxu1 %v684_v19 }
  0x16   :  { %361 = vmatpush.bf16.msra.mxu0 %v675_v20 }
  0x17   :  { %389 = vmatpush.bf16.msra.mxu2 %v691_v21 }
  0x18   :  { %403 = vmatpush.bf16.msra.mxu3 %v699_v22  ;;  %v713_v22 = vld [vmem:[#allocation2] ss:$0 sm:$0xff] }
  0x19   :  { %375 = vmatpush.bf16.msra.mxu1 %v683_v23 }
  0x1a   :  { %362 = vmatpush.bf16.msra.mxu0 %v674_v24 }
  0x1b   :  { %390 = vmatpush.bf16.msra.mxu2 %v690_v25 }
  0x1c   :  { %404 = vmatpush.bf16.msra.mxu3 %v698_v26 }
  0x1d   :  { %376 = vmatpush.bf16.msra.mxu1 %v682_v27 }
  0x1e   :  { %363 = vmatpush.bf16.msra.mxu0 %v673_v28 }
  0x1f   :  { %391 = vmatpush.bf16.msra.mxu2 %v689_v29 }
  0x20   :  { %405 = vmatpush.bf16.msra.mxu3 %v697_v30 }
  0x21   :  { %377 = vmatpush.bf16.msra.mxu1 %v681_v31  ;;  %364 = vmatmul.bf16.vlgmr.msra.gmra.mxu0 %v506_v41 }
  0x22   :  { %416 = vmatpush.bf16.msrb.mxu0 %v708_v40  ;;  %392 = vmatmul.bf16.vlgmr.msra.gmra.mxu2 %v514_v42 }
  0x23   :  { %406 = vmatmul.bf16.vlgmr.msra.gmra.mxu3 %v518_v43 }
  0x24   :  { %378 = vmatmul.bf16.vlgmr.msra.gmra.mxu1 %v510_v44 }
  0x26   :  { %417 = vmatpush.bf16.msrb.mxu0 %v707_v45 }
  0x2a   :  { %418 = vmatpush.bf16.msrb.mxu0 %v706_v46 }
  0x2e   :  { %419 = vmatpush.bf16.msrb.mxu0 %v705_v47 }
  0x31   :  { %667 = vmatmul.msk.bf16.vlgmr.msrb.gmra.mxu0 %vm352_vm0, %v522_v50 }
  0x9e   :  { %v365_v51 = vpop.f32.mrf.mxu0 }
  0x9f   :  { %v366_v55 = vadd.f32 %v709_v52, %v365_v51 }
  0xa1   :  { %v379_v53 = vpop.f32.mrf.mxu1 }
  0xa2   :  { %v380_v58 = vadd.f32 %v379_v53, %v366_v55 }
  0xa5   :  { %v393_v56 = vpop.f32.mrf.mxu2 }
  0xa6   :  { %v367_v57 = vpop.f32.mrf.mxu0  ;;  %v394_v59 = vadd.f32 %v393_v56, %v380_v58  ;;  %v407_v60 = vpop.f32.mrf.mxu3 }
  0xa7   :  { %v368_v61 = vadd.f32 %v709_v52, %v367_v57 }
  0xa8   :  { %v408_v63 = vadd.f32 %v407_v60, %v394_v59 }
  0xa9   :  { %v381_v62 = vpop.f32.mrf.mxu1 }
  0xaa   :  { %v382_v2 = vadd.f32 %v381_v62, %v368_v61 }
  0xad   :  { %v395_v0 = vpop.f32.mrf.mxu2 }
  0xae   :  { %v421_v1 = vpop.f32.mrf.mxu0  ;;  %v396_v5 = vadd.f32 %v395_v0, %v382_v2  ;;  %v409_v9 = vpop.f32.mrf.mxu3 }
  0xaf   :  { %v422_v3 = vadd.f32 %v421_v1, %v408_v63 }
  0xb0   :  { %v410_v12 = vadd.f32 %v409_v9, %v396_v5 }
  0xb1   :  { %vm426_vm1 = vcmp.ge.f32.partialorder %v422_v3, 0.0  ;;  %v428_v6 = vmul.f32 0.2, %v422_v3 }
  0xb3   :  { %v430_v8 = vsel %vm426_vm1, %v422_v3, %v428_v6 }
  0xb4   :  { %v436_v10 = vmul.f32 %v710_v4, %v430_v8 }
  0xb6   :  { %v423_v13 = vpop.f32.mrf.mxu0  ;;  %v442_v14 = vadd.f32 %v711_v7, %v436_v10 }
  0xb7   :  { %v424_v15 = vadd.f32 %v423_v13, %v410_v12 }
  0xb8   :  { %v448_v16 = vmul.f32 %v712_v11, %v442_v14 }
  0xb9   :  { %vm427_vm2 = vcmp.ge.f32.partialorder %v424_v15, 0.0  ;;  %v429_v17 = vmul.f32 0.2, %v424_v15 }
  0xba   :  { %450 = vadd.xlane.f32.xlu0 %v448_v16 }
  0xbb   :  { %v431_v18 = vsel %vm427_vm2, %v424_v15, %v429_v17 }
  0xbc   :  { %v437_v19 = vmul.f32 %v710_v4, %v431_v18 }
  0xbe   :  { %v443_v20 = vadd.f32 %v711_v7, %v437_v19 }
  0xc0   :  { %v449_v21 = vmul.f32 %v712_v11, %v443_v20 }
  0xc2   :  { %452 = vadd.xlane.f32.xlu0 %v449_v21 }
 0x12d   :  { %v451_v23 = vpop.xlane.xlu0 %450 }
 0x12e   :  { %v458_v24 = vadd.f32 %v713_v22, %v451_v23 }
 0x130   :  { %v460_v25 = vsub.f32 0.0, %v458_v24 }
 0x132   :  { %v462_v26 = vmul.f32 1.442695, %v460_v25 }
 0x134   :  { %714 = vpow2.f32 %v462_v26 }
 0x135   :  { %v453_v27 = vpop.xlane.xlu0 %452 }
 0x136   :  { %v459_v28 = vadd.f32 %v713_v22, %v453_v27 }
 0x138   :  { %v461_v29 = vsub.f32 0.0, %v459_v28 }
 0x13a   :  { %v715_v30 = vpop.eup %714  ;;  %v464_v31 = vmul.f32 1.442695, %v461_v29 }
 0x13b   :  { %v466_v32 = vadd.f32 1.0, %v715_v30 }
 0x13c   :  { %716 = vpow2.f32 %v464_v31 }
 0x13d   :  { %718 = vrcp.f32 %v466_v32  ;;  %v479_v38 = vand.u32 2147483648, %v466_v32  ;;  %v477_v40 = vand.u32 2147483647, %v466_v32  ;;  %vm473_vm4 = vweird.f32 %v466_v32 }
 0x13f   :  { %v480_v43 = vor.u32 1.1754944e-38, %v479_v38  ;;  %vm478_vm7 = vcmp.eq.f32.partialorder %v477_v40, 8.507059e+37 }
 0x142   :  { %v717_v33 = vpop.eup %716 }
 0x143   :  { %v719_v34 = vpop.eup %718  ;;  %v467_v35 = vadd.f32 1.0, %v717_v33 }
 0x144   :  { %v469_v36 = vmul.f32 %v719_v34, %v466_v32  ;;  %vm474_vm3 = vweird.f32 %v719_v34 }
 0x145   :  { %720 = vrcp.f32 %v467_v35  ;;  %vm475_vm6 = vmor %vm473_vm4, %vm474_vm3  ;;  %v493_v48 = vand.u32 2147483648, %v467_v35  ;;  %v491_v50 = vand.u32 2147483647, %v467_v35  ;;  %vm487_vm9 = vweird.f32 %v467_v35 }
 0x146   :  { %v470_v37 = vsub.f32 1.0, %v469_v36 }
 0x147   :  { %v494_v52 = vor.u32 1.1754944e-38, %v493_v48  ;;  %vm492_vm11 = vcmp.eq.f32.partialorder %v491_v50, 8.507059e+37 }
 0x148   :  { %v471_v39 = vmul.f32 %v719_v34, %v470_v37 }
 0x14a   :  { %v472_v41 = vadd.f32 %v719_v34, %v471_v39 }
 0x14b   :  { %v721_v42 = vpop.eup %720 }
 0x14c   :  { %v476_v44 = vsel %vm475_vm6, %v719_v34, %v472_v41  ;;  %v483_v45 = vmul.f32 %v721_v42, %v467_v35  ;;  %vm488_vm8 = vweird.f32 %v721_v42 }
 0x14d   :  { %v481_v46 = vsel %vm478_vm7, %v480_v43, %v476_v44  ;;  %vm489_vm10 = vmor %vm487_vm9, %vm488_vm8 }
 0x14e   :  { %497 = vst.msk [vmem:[%s930_s7] sm:$0xff] %vm496_vm5, %v481_v46  ;;  %v484_v47 = vsub.f32 1.0, %v483_v45 }
 0x150   :  { %v485_v49 = vmul.f32 %v721_v42, %v484_v47 }
 0x152   :  { %v486_v51 = vadd.f32 %v721_v42, %v485_v49 }
 0x154   :  { %v490_v53 = vsel %vm489_vm10, %v721_v42, %v486_v51 }
 0x155   :  { %v495_v54 = vsel %vm492_vm11, %v494_v52, %v490_v53 }
 0x156   :  { %498 = vst.msk [vmem:[%s930_s7 + $0x8] sm:$0xff] %vm496_vm5, %v495_v54 }

</bundles_post_ra>
